<compile_context>
chip_gen: v5e
topology: v5e:2x2
jax: 0.10.0
libtpu: 0.0.40
codegen_flags: <defaults>
</compile_context>

<pallas_src>
import functools

import jax
import jax.numpy as jnp
from jax.experimental import pallas as pl
from jax.experimental.pallas import tpu as pltpu

LANES = 128
SUBLANES = 8
TARGET_TILE_BYTES = 2 * 1024 * 1024   # per input, per pipeline buffer


def _num_tensorcores_per_chip():
    """Best-effort TensorCore count of the default device (multi-TC: v4/v5p/v7x)."""
    try:
        kind = jax.devices()[0].device_kind.lower()
    except Exception:
        return 1
    if "v7" in kind or "v4" in kind or "v5p" in kind:
        return 2
    return 1


def _rmse_partial_kernel(a_ref, b_ref, o_ref, *, tile_rows, tiles_per_core,
                         valid_rows, first_masked_blk, any_masked):
    c = pl.program_id(0)          # core axis ("parallel")
    i = pl.program_id(1)          # row-tile reduction axis ("arbitrary")

    @pl.when(i == 0)
    def _init():
        o_ref[...] = jnp.zeros_like(o_ref)

    a = a_ref[...].astype(jnp.float32)
    b = b_ref[...].astype(jnp.float32)
    d = a - b
    sq = d * d

    def _accumulate(x):
        # (tile_rows, 128) -> (tile_rows//8, 8, 128); summing the leading
        # (major) axis is vreg-wise VPU adds into the tiny (8,128) accumulator.
        o_ref[...] += x.reshape(tile_rows // SUBLANES, SUBLANES, LANES).sum(axis=0)

    if not any_masked:
        _accumulate(sq)
        return

    blk = c * tiles_per_core + i          # logical (unclamped) tile index

    @pl.when(blk < first_masked_blk)
    def _fast():
        _accumulate(sq)

    @pl.when(blk >= first_masked_blk)
    def _masked():
        # Rows whose *logical* global index is >= valid_rows are either the
        # ragged tail of the last real tile (garbage beyond the array boundary)
        # or a clamped duplicate tile on the last core; zero them before folding.
        row0 = blk * tile_rows
        local_row = jax.lax.broadcasted_iota(jnp.int32, sq.shape, 0)
        _accumulate(jnp.where(row0 + local_row < valid_rows, sq, 0.0))


def rmse_loss(yhat, y, *, num_cores=None):
    """sqrt(mean((yhat - y)**2)) over all elements via a Pallas TPU kernel."""
    assert yhat.shape == y.shape, "yhat and y must have the same shape"
    n_elems = int(yhat.size)
    assert n_elems > 0

    a = yhat.reshape(-1)
    b = y.reshape(-1)

    # Lane-dense (m, 128) view.  The reshape is free when n_elems % 128 == 0;
    # otherwise pad the <128-element tail with zeros (zeros add 0 to the
    # squared-error sum; the mean still divides by the true element count).
    rem = n_elems % LANES
    if rem:
        a = jnp.pad(a, (0, LANES - rem))
        b = jnp.pad(b, (0, LANES - rem))
    m = a.size // LANES
    if m < SUBLANES:
        # Tiny input: pad rows to one full (8, 128) tile (<4 KiB copy).
        pad_rows = SUBLANES - m
        a = jnp.pad(a, (0, pad_rows * LANES))
        b = jnp.pad(b, (0, pad_rows * LANES))
        m = SUBLANES
    a2 = a.reshape(m, LANES)
    b2 = b.reshape(m, LANES)

    # ~2 MiB per input per pipeline buffer, independent of dtype
    # (4096 rows f32 / 8192 rows bf16); always a multiple of 8 rows.
    itemsize = jnp.dtype(a2.dtype).itemsize
    tile_rows_target = max(SUBLANES, TARGET_TILE_BYTES // (LANES * itemsize))
    tile_rows = min(tile_rows_target, (m // SUBLANES) * SUBLANES)
    total_tiles = pl.cdiv(m, tile_rows)

    if num_cores is None:
        num_cores = _num_tensorcores_per_chip()
        if total_tiles < 2:
            num_cores = 1
    ncores = max(1, int(num_cores))
    tiles_per_core = pl.cdiv(total_tiles, ncores)

    clamp_needed = ncores * tiles_per_core > total_tiles
    first_masked_blk = m // tile_rows          # first tile that can see rows >= m
    any_masked = ncores * tiles_per_core > first_masked_blk

    def in_index(c, i):
        blk = c * tiles_per_core + i
        if clamp_needed:
            # Keep every DMA in bounds; fully out-of-range logical tiles are
            # zeroed in-kernel so they contribute nothing.
            blk = jnp.minimum(blk, total_tiles - 1)
        return (blk, 0)

    kernel = functools.partial(
        _rmse_partial_kernel,
        tile_rows=tile_rows,
        tiles_per_core=tiles_per_core,
        valid_rows=m,
        first_masked_blk=first_masked_blk,
        any_masked=any_masked,
    )

    partials = pl.pallas_call(
        kernel,
        out_shape=jax.ShapeDtypeStruct((ncores, SUBLANES, LANES), jnp.float32),
        grid_spec=pltpu.PrefetchScalarGridSpec(
            num_scalar_prefetch=0,
            grid=(ncores, tiles_per_core),
            in_specs=[
                pl.BlockSpec((tile_rows, LANES), in_index),
                pl.BlockSpec((tile_rows, LANES), in_index),
            ],
            out_specs=pl.BlockSpec((None, SUBLANES, LANES), lambda c, i: (c, 0, 0)),
        ),
        compiler_params=pltpu.CompilerParams(
            dimension_semantics=("parallel", "arbitrary"),
        ),
    )(a2, b2)

    # Tiny epilogue: ncores * 4 KiB of per-position partial sums -> scalar.
    return jnp.sqrt(jnp.sum(partials) / n_elems)


if __name__ == "__main__":
    def run_check(key, shape, dtype, rtol, **kw):
        k1, k2 = jax.random.split(key)
        yhat = jax.random.normal(k1, shape, dtype=jnp.float32).astype(dtype)
        y = jax.random.normal(k2, shape, dtype=jnp.float32).astype(dtype)
        loss = rmse_loss(yhat, y, **kw)
        jax.block_until_ready(loss)
        d = yhat.astype(jnp.float32) - y.astype(jnp.float32)
        ref = jnp.sqrt(jnp.mean(d * d))
        assert jnp.allclose(loss, ref, rtol=rtol, atol=1e-6), (shape, dtype, kw, loss, ref)

    key = jax.random.PRNGKey(0)

    # Primary small NCHW example (what the PyTorch module would receive).
    key, k1 = jax.random.split(key)
    run_check(k1, (2, 4, 16, 16), jnp.float32, 1e-5)

    # Odd-sized input: ragged tail (pad-to-128), multi-tile grid, gated
    # partial-tile masking, chip-gated core count.
    key, k2 = jax.random.split(key)
    run_check(k2, (2, 5, 229, 229), jnp.float32, 3e-5)

    # Force the 2-way core split (safe on single-TC chips: the extra axis is a
    # serial grid prefix) to exercise the parallel core axis + per-core blocks.
    key, k3 = jax.random.split(key)
    run_check(k3, (2, 5, 229, 229), jnp.float32, 3e-5, num_cores=2)

    # Force a split larger than total_tiles to exercise the clamped index_map
    # and fully-masked overflow tiles.
    key, k4 = jax.random.split(key)
    run_check(k4, (2, 4, 16, 16), jnp.float32, 1e-5, num_cores=2)

    # bf16 inputs: halved HBM traffic, larger tile_rows, f32 accumulation.
    key, k5 = jax.random.split(key)
    run_check(k5, (2, 4, 16, 16), jnp.bfloat16, 1e-5)

    print("KERNEL_OK")
</pallas_src>

<mosaic_0001>
module attributes {stable_mosaic.version = 11 : i64} {
  func.func @_rmse_partial_kernel(%arg0: i32, %arg1: i32, %arg2: memref<16x128xf32, #tpu.memory_space<vmem>>, %arg3: memref<16x128xf32, #tpu.memory_space<vmem>>, %arg4: memref<1x8x128xf32, #tpu.memory_space<vmem>>) attributes {dimension_semantics = [#tpu.dimension_semantics<parallel>, #tpu.dimension_semantics<arbitrary>], iteration_bounds = array<i64: 1, 1>, scalar_prefetch = 0 : i64, scratch_operands = 0 : i64, tpu.core_type = #tpu.core_type<tc>, window_params = [{transform_indices = @transform_0, window_bounds = array<i64: 16, 128>}, {transform_indices = @transform_1, window_bounds = array<i64: 16, 128>}, {transform_indices = @transform_2, window_bounds = array<i64: 1, 8, 128>}]} {
    %c0_i32 = arith.constant 0 : i32
    %0 = arith.cmpi eq, %arg1, %c0_i32 : i32
    %1 = arith.extui %0 : i1 to i32
    %c0_i32_0 = arith.constant 0 : i32
    %2 = arith.cmpi ne, %1, %c0_i32_0 : i32
    scf.if %2 {
      %cst_10 = arith.constant 0.000000e+00 : f32
      %15 = vector.broadcast %cst_10 : f32 to vector<8x128xf32>
      %c0_11 = arith.constant 0 : index
      %c0_12 = arith.constant 0 : index
      %c0_13 = arith.constant 0 : index
      %16 = vector.load %arg4[%c0_11, %c0_12, %c0_13] : memref<1x8x128xf32, #tpu.memory_space<vmem>>, vector<1x8x128xf32>
      %17 = vector.shape_cast %16 : vector<1x8x128xf32> to vector<8x128xf32>
      %18 = vector.shape_cast %15 : vector<8x128xf32> to vector<1x8x128xf32>
      tpu.vector_store %arg4[%c0_11, %c0_12, %c0_13], %18 {strides = array<i32>} : memref<1x8x128xf32, #tpu.memory_space<vmem>>, vector<1x8x128xf32>,
    } else {
    }
    %c0 = arith.constant 0 : index
    %c0_1 = arith.constant 0 : index
    %3 = vector.load %arg2[%c0, %c0_1] : memref<16x128xf32, #tpu.memory_space<vmem>>, vector<16x128xf32>
    %c0_2 = arith.constant 0 : index
    %c0_3 = arith.constant 0 : index
    %4 = vector.load %arg3[%c0_2, %c0_3] : memref<16x128xf32, #tpu.memory_space<vmem>>, vector<16x128xf32>
    %5 = arith.subf %3, %4 : vector<16x128xf32>
    %6 = arith.mulf %5, %5 : vector<16x128xf32>
    %c0_4 = arith.constant 0 : index
    %c0_5 = arith.constant 0 : index
    %c0_6 = arith.constant 0 : index
    %7 = vector.load %arg4[%c0_4, %c0_5, %c0_6] : memref<1x8x128xf32, #tpu.memory_space<vmem>>, vector<1x8x128xf32>
    %8 = vector.shape_cast %7 : vector<1x8x128xf32> to vector<8x128xf32>
    %9 = vector.shape_cast %6 : vector<16x128xf32> to vector<2x8x128xf32>
    %cst = arith.constant dense<0.000000e+00> : vector<8x128xf32>
    %10 = vector.multi_reduction <add>, %9, %cst [0] : vector<2x8x128xf32> to vector<8x128xf32>
    %11 = arith.addf %8, %10 : vector<8x128xf32>
    %c0_7 = arith.constant 0 : index
    %c0_8 = arith.constant 0 : index
    %c0_9 = arith.constant 0 : index
    %12 = vector.load %arg4[%c0_7, %c0_8, %c0_9] : memref<1x8x128xf32, #tpu.memory_space<vmem>>, vector<1x8x128xf32>
    %13 = vector.shape_cast %12 : vector<1x8x128xf32> to vector<8x128xf32>
    %14 = vector.shape_cast %11 : vector<8x128xf32> to vector<1x8x128xf32>
    tpu.vector_store %arg4[%c0_7, %c0_8, %c0_9], %14 {strides = array<i32>} : memref<1x8x128xf32, #tpu.memory_space<vmem>>, vector<1x8x128xf32>,
    return
  }
  func.func @transform_0(%arg0: i32, %arg1: i32) -> (i32, i32) {
    %c1_i32 = arith.constant 1 : i32
    %0 = arith.muli %arg0, %c1_i32 : i32
    %1 = arith.addi %0, %arg1 : i32
    %c0_i32 = arith.constant 0 : i32
    %c0_i32_0 = arith.constant 0 : i32
    return %1, %c0_i32 : i32, i32
  }
  func.func @transform_1(%arg0: i32, %arg1: i32) -> (i32, i32) {
    %c1_i32 = arith.constant 1 : i32
    %0 = arith.muli %arg0, %c1_i32 : i32
    %1 = arith.addi %0, %arg1 : i32
    %c0_i32 = arith.constant 0 : i32
    %c0_i32_0 = arith.constant 0 : i32
    return %1, %c0_i32 : i32, i32
  }
  func.func @transform_2(%arg0: i32, %arg1: i32) -> (i32, i32, i32) {
    %c0_i32 = arith.constant 0 : i32
    %c0_i32_0 = arith.constant 0 : i32
    %c0_i32_1 = arith.constant 0 : i32
    return %arg0, %c0_i32, %c0_i32_0 : i32, i32, i32
  }
}

</mosaic_0001>

<bundles_post_ra>
// kernel: tpu_custom_call.1
= control target key start
LH: loop header
LB: loop body
LE: loop exit
PB: predicated region body
PF: predicated region fallthrough
CT: control target
= control target key end

     0   :  { %7 = vsyncpa [#allocation3], 0  ;;  %s204_s0 = inlined_call_operand.hbm [shape: f32[16,128], index: 0, kind: input, shape index: {}]   ;;  %s205_s1 = inlined_call_operand.hbm [shape: f32[16,128], index: 1, kind: input, shape index: {}]   ;;  %s206_s2 = inlined_call_operand.hbm [shape: f32[1,8,128], index: 2, kind: output, shape index: {}]  }
   0x1   :  { %8 = vsyncpa [#allocation6], 0 }
   0x2   :  { %9 = vsyncpa [#allocation4], 0  ;;  %s18_s11 = sshll.u32 %s204_s0, 4  ;;  %s175_s12 = smov [#allocation2]   ;;  %s19_s11 = int_to_ptr.hbm [resolvable:$true] %s18_s11 }
   0x3   :  { %s20_s13 = sshll.u32 %s175_s12, 4  ;;  %s35_s16 = sshll.u32 %s205_s1, 4  ;;  %s21_s13 = int_to_ptr.vmem [resolvable:$true] %s20_s13  ;;  %s36_s16 = int_to_ptr.hbm [resolvable:$true] %s35_s16 }
   0x4   :  { %s176_s17 = smov 128   ;;  %s177_s18 = smov 8  }
   0x5   :  { %26 = dma.hbm_to_vmem [thread:$0]  %s19_s11, 256, %s21_s13, [#allocation3], %s176_s17, %s176_s17, %s177_s18  }
   0x6   :  { %s178_s19 = smov [#allocation5]  }
   0x7   :  { %s37_s20 = sshll.u32 %s178_s19, 4  ;;  %s38_s20 = int_to_ptr.vmem [resolvable:$true] %s37_s20 }
   0x8   :  { %43 = dma.hbm_to_vmem [thread:$0]  %s36_s16, 256, %s38_s20, [#allocation6], %s176_s17, %s176_s17, %s177_s18  }
   0x9   :  { %169 = dma.done.wait [#allocation3], 256  }
   0xa   :  { %170 = vsyncadd [#allocation3], 4294967040 }
   0xb   :  { %171 = dma.done.wait [#allocation6], 256  }
   0xc   :  { %172 = vsyncadd [#allocation6], 4294967040  ;;  %v61_v0 = vld [vmem:[#allocation2] sm:$0xff]  ;;  %v62_v1 = vld [vmem:[#allocation2 + $0x8] sm:$0xff]  ;;  %s179_s0 = smov [#allocation7]   ;;  %s80_s23 = sshll.u32 %s206_s2, 4  ;;  %s81_s23 = int_to_ptr.hbm [resolvable:$true] %s80_s23 }
   0xd   :  { %v63_v2 = vld [vmem:[#allocation5] sm:$0xff]  ;;  %v64_v3 = vld [vmem:[#allocation5 + $0x8] sm:$0xff]  ;;  %s78_s1 = sshll.u32 %s179_s0, 4  ;;  %s79_s1 = int_to_ptr.vmem [resolvable:$true] %s78_s1 }
   0xe   :  { %v65_v4 = vsub.f32 %v61_v0, %v63_v2  ;;  %v66_v5 = vsub.f32 %v62_v1, %v64_v3 }
  0x10   :  { %v67_v6 = vmul.f32 %v65_v4, %v65_v4  ;;  %v68_v7 = vmul.f32 %v66_v5, %v66_v5 }
  0x12   :  { %v70_v8 = vadd.f32 %v68_v7, %v67_v6 }
  0x14   :  { %72 = vst [vmem:[#allocation7] sm:$0xff] %v70_v8 }
  0x15   :  { %83 = dma.vmem_to_hbm [thread:$0]  %s79_s1, 128, %s81_s23, [#allocation4]  }
  0x16   :  { %173 = dma.done.wait [#allocation4], 128  }
  0x17   :  { %174 = vsyncadd [#allocation4], 4294967168 }
  0x18   :  { %88 = vsyncpa [#allocation3], 1 }
  0x19   :  { %89 = vsyncpa [#allocation6], 1 }
  0x1a   :  { %90 = vsyncpa [#allocation4], 1 }

</bundles_post_ra>
